<compile_context>
chip_gen: v7x
topology: tpu7x:2x2x1
jax: 0.10.0
libtpu: 0.0.40
codegen_flags: <defaults>
</compile_context>

<pallas_src>
import functools

import jax
import jax.numpy as jnp
from jax import lax
from jax.experimental import pallas as pl
from jax.experimental.pallas import tpu as pltpu

EPS = 1e-5


def _outproj_kernel(num_n, num_h, num_w, cin, cout, eps,
                    x_ref, a1_ref, b1_ref, a2_ref, b2_ref, gl_ref, bl_ref,
                    p_ref, s1_ref, s2_ref,
                    o_ref, l1_ref, h1_ref, l2_ref):
    # x_ref:  (N*H, W*Cin)        lane-merged input slab
    # a1_ref: (3*W*Cin, W*Cout)   conv1 block-banded weight matrix
    # a2_ref: (3*W*Cout, W*Cout)  conv2 block-banded weight matrix
    # b1/b2:  (1, W*Cout)         biases tiled across the W lane-groups
    # gl/bl:  (1, W*Cout)         BatchNorm gamma/beta tiled across lane-groups
    # p_ref:  (W*Cout, W*Cout)    0/1 channel fold+broadcast matrix
    # s1/s2:  (1,) SMEM           PReLU slopes (num_parameters=1)
    # o_ref:  (N*H, W*Cout)       lane-merged output slab
    # l1_ref: (N*H, 3*W*Cin)      conv1 LHS scratch (vertically shifted rows)
    # h1_ref: (N*H, W*Cout)       conv1 activation scratch
    # l2_ref: (N*H, 3*W*Cout)     conv2 LHS scratch

    def build_rows(dst_ref, src_ref, kblock):
        # dst[n*H + h, ky*kblock : (ky+1)*kblock] = src row (n, h + ky - 1),
        # zero where the vertical tap falls outside the image.
        dst_ref[...] = jnp.zeros_like(dst_ref)
        for img in range(num_n):
            base = img * num_h
            for ky in range(3):
                h_lo = max(0, 1 - ky)
                h_hi = min(num_h - 1, num_h - ky)   # inclusive
                nrows = h_hi - h_lo + 1
                src_lo = h_lo + ky - 1
                dst_ref[base + h_lo:base + h_lo + nrows,
                        ky * kblock:(ky + 1) * kblock] = (
                    src_ref[base + src_lo:base + src_lo + nrows, :])

    # ---- conv1: one lane-dense MXU matmul + bias + PReLU --------------------
    build_rows(l1_ref, x_ref, num_w * cin)
    acc1 = jnp.dot(l1_ref[...], a1_ref[...],
                   preferred_element_type=jnp.float32) + b1_ref[...]
    h1_ref[...] = jnp.where(acc1 >= 0.0, acc1, s1_ref[0] * acc1)

    # ---- conv2: one lane-dense MXU matmul + bias + PReLU --------------------
    build_rows(l2_ref, h1_ref, num_w * cout)
    acc2 = jnp.dot(l2_ref[...], a2_ref[...],
                   preferred_element_type=jnp.float32) + b2_ref[...]
    h2 = jnp.where(acc2 >= 0.0, acc2, s2_ref[0] * acc2)

    # ---- BatchNorm2d (training-mode batch stats, biased variance) -----------
    # Two-pass / centered statistics.  P folds the W lane-groups into
    # per-channel sums and broadcasts them back across lanes in one go.
    m = num_n * num_h * num_w
    inv_m = 1.0 / float(m)
    p = p_ref[...]
    mean_lane = jnp.sum(jnp.dot(h2, p, preferred_element_type=jnp.float32),
                        axis=0, keepdims=True) * inv_m
    d = h2 - mean_lane
    var_lane = jnp.sum(jnp.dot(d * d, p, preferred_element_type=jnp.float32),
                       axis=0, keepdims=True) * inv_m
    scale = lax.rsqrt(var_lane + eps) * gl_ref[...]
    shift = bl_ref[...] - mean_lane * scale
    o_ref[...] = h2 * scale + shift


def _conv_row_matrix(w_hwio, width):
    """(3,3,Ci,Co) HWIO weights -> block-banded (3*W*Ci, W*Co) matrix.

    A[ky*W*Ci + wi*Ci + ci, wo*Co + co] = w[ky, wi-wo+1, ci, co] when the
    horizontal tap is in range, else 0 (this IS the SAME zero padding in W).
    """
    kh, kw, ci, co = w_hwio.shape
    wi = jnp.arange(width)[:, None]
    wo = jnp.arange(width)[None, :]
    kx = wi - wo + 1                                   # (W, W)
    valid = (kx >= 0) & (kx < kw)
    kx_c = jnp.clip(kx, 0, kw - 1)
    vals = w_hwio[:, kx_c]                             # (3, W, W, Ci, Co)
    vals = vals * valid[None, :, :, None, None]
    a = jnp.transpose(vals, (0, 1, 3, 2, 4)).reshape(kh * width * ci, width * co)
    return a.astype(jnp.float32)


def outproj_forward_nhwc(x_nhwc, params):
    """x_nhwc: (N, H, W, Cin) float32 -> (N, H, W, Cout) float32."""
    w1, b1, a1, w2, b2, a2, gamma, beta = params
    n, h, w, cin = x_nhwc.shape
    cout = w1.shape[-1]

    x_slab = x_nhwc.reshape(n * h, w * cin).astype(jnp.float32)

    a1m = _conv_row_matrix(w1, w)                      # (3*W*Cin,  W*Cout)
    a2m = _conv_row_matrix(w2, w)                      # (3*W*Cout, W*Cout)
    b1_lane = jnp.tile(b1, w).reshape(1, w * cout).astype(jnp.float32)
    b2_lane = jnp.tile(b2, w).reshape(1, w * cout).astype(jnp.float32)
    g_lane = jnp.tile(gamma, w).reshape(1, w * cout).astype(jnp.float32)
    be_lane = jnp.tile(beta, w).reshape(1, w * cout).astype(jnp.float32)
    p_mat = jnp.tile(jnp.eye(cout, dtype=jnp.float32), (w, w))  # (W*Co, W*Co)

    vmem = pl.BlockSpec(memory_space=pltpu.MemorySpace.VMEM)
    smem = pl.BlockSpec(memory_space=pltpu.MemorySpace.SMEM)

    kernel = functools.partial(_outproj_kernel, n, h, w, cin, cout, EPS)

    out_slab = pl.pallas_call(
        kernel,
        out_shape=jax.ShapeDtypeStruct((n * h, w * cout), jnp.float32),
        in_specs=[vmem] * 8 + [smem, smem],
        out_specs=vmem,
        scratch_shapes=[
            pltpu.VMEM((n * h, 3 * w * cin), jnp.float32),    # conv1 LHS
            pltpu.VMEM((n * h, w * cout), jnp.float32),       # h1
            pltpu.VMEM((n * h, 3 * w * cout), jnp.float32),   # conv2 LHS
        ],
    )(x_slab, a1m, b1_lane, a2m, b2_lane, g_lane, be_lane, p_mat,
      a1.reshape(1).astype(jnp.float32), a2.reshape(1).astype(jnp.float32))

    return out_slab.reshape(n, h, w, cout)


def outproj_forward(x_nchw, params):
    """PyTorch-layout entry: (N, Cin, H, W) -> (N, Cout, H, W)."""
    # NOTE: the boundary transposes exist only to match the NCHW module API;
    # production callers should use outproj_forward_nhwc directly.
    x_nhwc = jnp.transpose(x_nchw, (0, 2, 3, 1)).astype(jnp.float32)
    y_nhwc = outproj_forward_nhwc(x_nhwc, params)
    return jnp.transpose(y_nhwc, (0, 3, 1, 2))


def make_params(key, ch_in, ch_out):
    """Deterministic synthetic parameters (shapes match the torch module)."""
    k1, k2, k3, k4 = jax.random.split(key, 4)
    # conv weights kept in HWIO (3, 3, C_in, C_out) layout for the NHWC kernel
    w1 = jax.random.normal(k1, (3, 3, ch_in, ch_out), jnp.float32) * 0.1
    b1 = jax.random.normal(k2, (ch_out,), jnp.float32) * 0.01
    w2 = jax.random.normal(k3, (3, 3, ch_out, ch_out), jnp.float32) * 0.1
    b2 = jax.random.normal(k4, (ch_out,), jnp.float32) * 0.01
    a1 = jnp.full((1,), 0.25, jnp.float32)        # PReLU default init
    a2 = jnp.full((1,), 0.25, jnp.float32)
    gamma = jnp.ones((ch_out,), jnp.float32)      # BatchNorm2d affine defaults
    beta = jnp.zeros((ch_out,), jnp.float32)
    return (w1, b1, a1, w2, b2, a2, gamma, beta)


def outproj_reference(x_nchw, params):
    """Pure-JAX reference (lax.conv) used only for a correctness check."""
    w1, b1, a1, w2, b2, a2, gamma, beta = params
    x = jnp.transpose(x_nchw, (0, 2, 3, 1)).astype(jnp.float32)
    dn = lax.conv_dimension_numbers(x.shape, w1.shape, ("NHWC", "HWIO", "NHWC"))

    def prelu(v, a):
        return jnp.where(v >= 0, v, a * v)

    h1 = lax.conv_general_dilated(x, w1, (1, 1), "SAME", dimension_numbers=dn) + b1
    h1 = prelu(h1, a1[0])
    h2 = lax.conv_general_dilated(h1, w2, (1, 1), "SAME", dimension_numbers=dn) + b2
    h2 = prelu(h2, a2[0])
    mean = jnp.mean(h2, axis=(0, 1, 2), keepdims=True)
    var = jnp.mean((h2 - mean) ** 2, axis=(0, 1, 2), keepdims=True)
    y = (h2 - mean) * lax.rsqrt(var + EPS) * gamma + beta
    return jnp.transpose(y, (0, 3, 1, 2))


if __name__ == "__main__":
    key = jax.random.PRNGKey(0)
    kx, kp = jax.random.split(key)

    N, CH_IN, CH_OUT, H, W = 2, 4, 8, 16, 16
    x = jax.random.normal(kx, (N, CH_IN, H, W), jnp.float32)
    params = make_params(kp, CH_IN, CH_OUT)

    out = jax.block_until_ready(outproj_forward(x, params))
    ref = jax.block_until_ready(outproj_reference(x, params))

    assert out.shape == (N, CH_OUT, H, W)
    assert jnp.allclose(out, ref, atol=1e-4, rtol=1e-4), "mismatch vs reference"

    print("KERNEL_OK")
</pallas_src>

<mosaic_0001>
module attributes {stable_mosaic.version = 11 : i64} {
  func.func @_outproj_kernel(%arg0: memref<32x64xf32, #tpu.memory_space<vmem>>, %arg1: memref<192x128xf32, #tpu.memory_space<vmem>>, %arg2: memref<1x128xf32, #tpu.memory_space<vmem>>, %arg3: memref<384x128xf32, #tpu.memory_space<vmem>>, %arg4: memref<1x128xf32, #tpu.memory_space<vmem>>, %arg5: memref<1x128xf32, #tpu.memory_space<vmem>>, %arg6: memref<1x128xf32, #tpu.memory_space<vmem>>, %arg7: memref<128x128xf32, #tpu.memory_space<vmem>>, %arg8: memref<1xf32, #tpu.memory_space<smem>>, %arg9: memref<1xf32, #tpu.memory_space<smem>>, %arg10: memref<32x128xf32, #tpu.memory_space<vmem>>, %arg11: memref<32x192xf32, #tpu.memory_space<vmem>>, %arg12: memref<32x128xf32, #tpu.memory_space<vmem>>, %arg13: memref<32x384xf32, #tpu.memory_space<vmem>>) attributes {dimension_semantics = [], scalar_prefetch = 0 : i64, scratch_operands = 3 : i64, tpu.core_type = #tpu.core_type<tc>} {
    %cst = arith.constant 0.000000e+00 : f32
    %0 = vector.broadcast %cst : f32 to vector<32x192xf32>
    %c0 = arith.constant 0 : index
    %c0_0 = arith.constant 0 : index
    %1 = vector.load %arg11[%c0, %c0_0] : memref<32x192xf32, #tpu.memory_space<vmem>>, vector<32x192xf32>
    tpu.vector_store %arg11[%c0, %c0_0], %0 {strides = array<i32>} : memref<32x192xf32, #tpu.memory_space<vmem>>, vector<32x192xf32>,
    %c0_1 = arith.constant 0 : index
    %c0_2 = arith.constant 0 : index
    %2 = vector.load %arg0[%c0_1, %c0_2] : memref<32x64xf32, #tpu.memory_space<vmem>>, vector<15x64xf32>
    %c1 = arith.constant 1 : index
    %c0_3 = arith.constant 0 : index
    %3 = vector.load %arg11[%c1, %c0_3] : memref<32x192xf32, #tpu.memory_space<vmem>>, vector<15x64xf32>
    tpu.vector_store %arg11[%c1, %c0_3], %2 {strides = array<i32>} : memref<32x192xf32, #tpu.memory_space<vmem>>, vector<15x64xf32>,
    %c0_4 = arith.constant 0 : index
    %c0_5 = arith.constant 0 : index
    %4 = vector.load %arg0[%c0_4, %c0_5] : memref<32x64xf32, #tpu.memory_space<vmem>>, vector<16x64xf32>
    %c0_6 = arith.constant 0 : index
    %c64 = arith.constant 64 : index
    %5 = vector.load %arg11[%c0_6, %c64] : memref<32x192xf32, #tpu.memory_space<vmem>>, vector<16x64xf32>
    tpu.vector_store %arg11[%c0_6, %c64], %4 {strides = array<i32>} : memref<32x192xf32, #tpu.memory_space<vmem>>, vector<16x64xf32>,
    %c1_7 = arith.constant 1 : index
    %c0_8 = arith.constant 0 : index
    %6 = vector.load %arg0[%c1_7, %c0_8] : memref<32x64xf32, #tpu.memory_space<vmem>>, vector<15x64xf32>
    %c0_9 = arith.constant 0 : index
    %c128 = arith.constant 128 : index
    %7 = vector.load %arg11[%c0_9, %c128] : memref<32x192xf32, #tpu.memory_space<vmem>>, vector<15x64xf32>
    tpu.vector_store %arg11[%c0_9, %c128], %6 {strides = array<i32>} : memref<32x192xf32, #tpu.memory_space<vmem>>, vector<15x64xf32>,
    %c16 = arith.constant 16 : index
    %c0_10 = arith.constant 0 : index
    %8 = vector.load %arg0[%c16, %c0_10] : memref<32x64xf32, #tpu.memory_space<vmem>>, vector<15x64xf32>
    %c17 = arith.constant 17 : index
    %c0_11 = arith.constant 0 : index
    %9 = vector.load %arg11[%c17, %c0_11] : memref<32x192xf32, #tpu.memory_space<vmem>>, vector<15x64xf32>
    tpu.vector_store %arg11[%c17, %c0_11], %8 {strides = array<i32>} : memref<32x192xf32, #tpu.memory_space<vmem>>, vector<15x64xf32>,
    %c16_12 = arith.constant 16 : index
    %c0_13 = arith.constant 0 : index
    %10 = vector.load %arg0[%c16_12, %c0_13] : memref<32x64xf32, #tpu.memory_space<vmem>>, vector<16x64xf32>
    %c16_14 = arith.constant 16 : index
    %c64_15 = arith.constant 64 : index
    %11 = vector.load %arg11[%c16_14, %c64_15] : memref<32x192xf32, #tpu.memory_space<vmem>>, vector<16x64xf32>
    tpu.vector_store %arg11[%c16_14, %c64_15], %10 {strides = array<i32>} : memref<32x192xf32, #tpu.memory_space<vmem>>, vector<16x64xf32>,
    %c17_16 = arith.constant 17 : index
    %c0_17 = arith.constant 0 : index
    %12 = vector.load %arg0[%c17_16, %c0_17] : memref<32x64xf32, #tpu.memory_space<vmem>>, vector<15x64xf32>
    %c16_18 = arith.constant 16 : index
    %c128_19 = arith.constant 128 : index
    %13 = vector.load %arg11[%c16_18, %c128_19] : memref<32x192xf32, #tpu.memory_space<vmem>>, vector<15x64xf32>
    tpu.vector_store %arg11[%c16_18, %c128_19], %12 {strides = array<i32>} : memref<32x192xf32, #tpu.memory_space<vmem>>, vector<15x64xf32>,
    %c0_20 = arith.constant 0 : index
    %c0_21 = arith.constant 0 : index
    %14 = vector.load %arg11[%c0_20, %c0_21] : memref<32x192xf32, #tpu.memory_space<vmem>>, vector<32x192xf32>
    %c0_22 = arith.constant 0 : index
    %c0_23 = arith.constant 0 : index
    %15 = vector.load %arg1[%c0_22, %c0_23] : memref<192x128xf32, #tpu.memory_space<vmem>>, vector<192x128xf32>
    %cst_24 = arith.constant dense<0.000000e+00> : vector<32x128xf32>
    %16 = tpu.matmul %14, %15, %cst_24 {dimension_numbers = #tpu.dot_dimension_numbers<[1], [0], [0], [1], [0, 0, 1, 1], [], []>} : vector<32x192xf32>, vector<192x128xf32>, vector<32x128xf32> -> vector<32x128xf32>
    %c0_25 = arith.constant 0 : index
    %c0_26 = arith.constant 0 : index
    %17 = vector.load %arg2[%c0_25, %c0_26] : memref<1x128xf32, #tpu.memory_space<vmem>>, vector<1x128xf32>
    %18 = vector.broadcast %17 : vector<1x128xf32> to vector<32x128xf32>
    %19 = arith.addf %16, %18 : vector<32x128xf32>
    %cst_27 = arith.constant 0.000000e+00 : f32
    %20 = vector.broadcast %cst_27 : f32 to vector<32x128xf32>
    %21 = arith.cmpf oge, %19, %20 : vector<32x128xf32>
    %c0_28 = arith.constant 0 : index
    %22 = memref.load %arg8[%c0_28] : memref<1xf32, #tpu.memory_space<smem>>
    %23 = vector.broadcast %22 : f32 to vector<32x128xf32>
    %24 = arith.mulf %23, %19 : vector<32x128xf32>
    %25 = arith.select %21, %19, %24 : vector<32x128xi1>, vector<32x128xf32>
    %c0_29 = arith.constant 0 : index
    %c0_30 = arith.constant 0 : index
    %26 = vector.load %arg12[%c0_29, %c0_30] : memref<32x128xf32, #tpu.memory_space<vmem>>, vector<32x128xf32>
    tpu.vector_store %arg12[%c0_29, %c0_30], %25 {strides = array<i32>} : memref<32x128xf32, #tpu.memory_space<vmem>>, vector<32x128xf32>,
    %cst_31 = arith.constant 0.000000e+00 : f32
    %27 = vector.broadcast %cst_31 : f32 to vector<32x384xf32>
    %c0_32 = arith.constant 0 : index
    %c0_33 = arith.constant 0 : index
    %28 = vector.load %arg13[%c0_32, %c0_33] : memref<32x384xf32, #tpu.memory_space<vmem>>, vector<32x384xf32>
    tpu.vector_store %arg13[%c0_32, %c0_33], %27 {strides = array<i32>} : memref<32x384xf32, #tpu.memory_space<vmem>>, vector<32x384xf32>,
    %c0_34 = arith.constant 0 : index
    %c0_35 = arith.constant 0 : index
    %29 = vector.load %arg12[%c0_34, %c0_35] : memref<32x128xf32, #tpu.memory_space<vmem>>, vector<15x128xf32>
    %c1_36 = arith.constant 1 : index
    %c0_37 = arith.constant 0 : index
    %30 = vector.load %arg13[%c1_36, %c0_37] : memref<32x384xf32, #tpu.memory_space<vmem>>, vector<15x128xf32>
    tpu.vector_store %arg13[%c1_36, %c0_37], %29 {strides = array<i32>} : memref<32x384xf32, #tpu.memory_space<vmem>>, vector<15x128xf32>,
    %c0_38 = arith.constant 0 : index
    %c0_39 = arith.constant 0 : index
    %31 = vector.load %arg12[%c0_38, %c0_39] : memref<32x128xf32, #tpu.memory_space<vmem>>, vector<16x128xf32>
    %c0_40 = arith.constant 0 : index
    %c128_41 = arith.constant 128 : index
    %32 = vector.load %arg13[%c0_40, %c128_41] : memref<32x384xf32, #tpu.memory_space<vmem>>, vector<16x128xf32>
    tpu.vector_store %arg13[%c0_40, %c128_41], %31 {strides = array<i32>} : memref<32x384xf32, #tpu.memory_space<vmem>>, vector<16x128xf32>,
    %c1_42 = arith.constant 1 : index
    %c0_43 = arith.constant 0 : index
    %33 = vector.load %arg12[%c1_42, %c0_43] : memref<32x128xf32, #tpu.memory_space<vmem>>, vector<15x128xf32>
    %c0_44 = arith.constant 0 : index
    %c256 = arith.constant 256 : index
    %34 = vector.load %arg13[%c0_44, %c256] : memref<32x384xf32, #tpu.memory_space<vmem>>, vector<15x128xf32>
    tpu.vector_store %arg13[%c0_44, %c256], %33 {strides = array<i32>} : memref<32x384xf32, #tpu.memory_space<vmem>>, vector<15x128xf32>,
    %c16_45 = arith.constant 16 : index
    %c0_46 = arith.constant 0 : index
    %35 = vector.load %arg12[%c16_45, %c0_46] : memref<32x128xf32, #tpu.memory_space<vmem>>, vector<15x128xf32>
    %c17_47 = arith.constant 17 : index
    %c0_48 = arith.constant 0 : index
    %36 = vector.load %arg13[%c17_47, %c0_48] : memref<32x384xf32, #tpu.memory_space<vmem>>, vector<15x128xf32>
    tpu.vector_store %arg13[%c17_47, %c0_48], %35 {strides = array<i32>} : memref<32x384xf32, #tpu.memory_space<vmem>>, vector<15x128xf32>,
    %c16_49 = arith.constant 16 : index
    %c0_50 = arith.constant 0 : index
    %37 = vector.load %arg12[%c16_49, %c0_50] : memref<32x128xf32, #tpu.memory_space<vmem>>, vector<16x128xf32>
    %c16_51 = arith.constant 16 : index
    %c128_52 = arith.constant 128 : index
    %38 = vector.load %arg13[%c16_51, %c128_52] : memref<32x384xf32, #tpu.memory_space<vmem>>, vector<16x128xf32>
    tpu.vector_store %arg13[%c16_51, %c128_52], %37 {strides = array<i32>} : memref<32x384xf32, #tpu.memory_space<vmem>>, vector<16x128xf32>,
    %c17_53 = arith.constant 17 : index
    %c0_54 = arith.constant 0 : index
    %39 = vector.load %arg12[%c17_53, %c0_54] : memref<32x128xf32, #tpu.memory_space<vmem>>, vector<15x128xf32>
    %c16_55 = arith.constant 16 : index
    %c256_56 = arith.constant 256 : index
    %40 = vector.load %arg13[%c16_55, %c256_56] : memref<32x384xf32, #tpu.memory_space<vmem>>, vector<15x128xf32>
    tpu.vector_store %arg13[%c16_55, %c256_56], %39 {strides = array<i32>} : memref<32x384xf32, #tpu.memory_space<vmem>>, vector<15x128xf32>,
    %c0_57 = arith.constant 0 : index
    %c0_58 = arith.constant 0 : index
    %41 = vector.load %arg13[%c0_57, %c0_58] : memref<32x384xf32, #tpu.memory_space<vmem>>, vector<32x384xf32>
    %c0_59 = arith.constant 0 : index
    %c0_60 = arith.constant 0 : index
    %42 = vector.load %arg3[%c0_59, %c0_60] : memref<384x128xf32, #tpu.memory_space<vmem>>, vector<384x128xf32>
    %cst_61 = arith.constant dense<0.000000e+00> : vector<32x128xf32>
    %43 = tpu.matmul %41, %42, %cst_61 {dimension_numbers = #tpu.dot_dimension_numbers<[1], [0], [0], [1], [0, 0, 1, 1], [], []>} : vector<32x384xf32>, vector<384x128xf32>, vector<32x128xf32> -> vector<32x128xf32>
    %c0_62 = arith.constant 0 : index
    %c0_63 = arith.constant 0 : index
    %44 = vector.load %arg4[%c0_62, %c0_63] : memref<1x128xf32, #tpu.memory_space<vmem>>, vector<1x128xf32>
    %45 = vector.broadcast %44 : vector<1x128xf32> to vector<32x128xf32>
    %46 = arith.addf %43, %45 : vector<32x128xf32>
    %cst_64 = arith.constant 0.000000e+00 : f32
    %47 = vector.broadcast %cst_64 : f32 to vector<32x128xf32>
    %48 = arith.cmpf oge, %46, %47 : vector<32x128xf32>
    %c0_65 = arith.constant 0 : index
    %49 = memref.load %arg9[%c0_65] : memref<1xf32, #tpu.memory_space<smem>>
    %50 = vector.broadcast %49 : f32 to vector<32x128xf32>
    %51 = arith.mulf %50, %46 : vector<32x128xf32>
    %52 = arith.select %48, %46, %51 : vector<32x128xi1>, vector<32x128xf32>
    %c0_66 = arith.constant 0 : index
    %c0_67 = arith.constant 0 : index
    %53 = vector.load %arg7[%c0_66, %c0_67] : memref<128x128xf32, #tpu.memory_space<vmem>>, vector<128x128xf32>
    %cst_68 = arith.constant dense<0.000000e+00> : vector<32x128xf32>
    %54 = tpu.matmul %52, %53, %cst_68 {dimension_numbers = #tpu.dot_dimension_numbers<[1], [0], [0], [1], [0, 0, 1, 1], [], []>} : vector<32x128xf32>, vector<128x128xf32>, vector<32x128xf32> -> vector<32x128xf32>
    %cst_69 = arith.constant dense<0.000000e+00> : vector<128xf32>
    %55 = vector.multi_reduction <add>, %54, %cst_69 [0] : vector<32x128xf32> to vector<128xf32>
    %56 = vector.shape_cast %55 : vector<128xf32> to vector<1x128xf32>
    %cst_70 = arith.constant 0.001953125 : f32
    %57 = vector.broadcast %cst_70 : f32 to vector<1x128xf32>
    %58 = arith.mulf %56, %57 : vector<1x128xf32>
    %59 = vector.broadcast %58 : vector<1x128xf32> to vector<32x128xf32>
    %60 = arith.subf %52, %59 : vector<32x128xf32>
    %61 = arith.mulf %60, %60 : vector<32x128xf32>
    %cst_71 = arith.constant dense<0.000000e+00> : vector<32x128xf32>
    %62 = tpu.matmul %61, %53, %cst_71 {dimension_numbers = #tpu.dot_dimension_numbers<[1], [0], [0], [1], [0, 0, 1, 1], [], []>} : vector<32x128xf32>, vector<128x128xf32>, vector<32x128xf32> -> vector<32x128xf32>
    %cst_72 = arith.constant dense<0.000000e+00> : vector<128xf32>
    %63 = vector.multi_reduction <add>, %62, %cst_72 [0] : vector<32x128xf32> to vector<128xf32>
    %64 = vector.shape_cast %63 : vector<128xf32> to vector<1x128xf32>
    %cst_73 = arith.constant 0.001953125 : f32
    %65 = vector.broadcast %cst_73 : f32 to vector<1x128xf32>
    %66 = arith.mulf %64, %65 : vector<1x128xf32>
    %cst_74 = arith.constant 9.99999974E-6 : f32
    %67 = vector.broadcast %cst_74 : f32 to vector<1x128xf32>
    %68 = arith.addf %66, %67 : vector<1x128xf32>
    %69 = math.rsqrt %68 : vector<1x128xf32>
    %c0_75 = arith.constant 0 : index
    %c0_76 = arith.constant 0 : index
    %70 = vector.load %arg5[%c0_75, %c0_76] : memref<1x128xf32, #tpu.memory_space<vmem>>, vector<1x128xf32>
    %71 = arith.mulf %69, %70 : vector<1x128xf32>
    %c0_77 = arith.constant 0 : index
    %c0_78 = arith.constant 0 : index
    %72 = vector.load %arg6[%c0_77, %c0_78] : memref<1x128xf32, #tpu.memory_space<vmem>>, vector<1x128xf32>
    %73 = arith.mulf %58, %71 : vector<1x128xf32>
    %74 = arith.subf %72, %73 : vector<1x128xf32>
    %75 = vector.broadcast %71 : vector<1x128xf32> to vector<32x128xf32>
    %76 = arith.mulf %52, %75 : vector<32x128xf32>
    %77 = vector.broadcast %74 : vector<1x128xf32> to vector<32x128xf32>
    %78 = arith.addf %76, %77 : vector<32x128xf32>
    %c0_79 = arith.constant 0 : index
    %c0_80 = arith.constant 0 : index
    %79 = vector.load %arg10[%c0_79, %c0_80] : memref<32x128xf32, #tpu.memory_space<vmem>>, vector<32x128xf32>
    tpu.vector_store %arg10[%c0_79, %c0_80], %78 {strides = array<i32>} : memref<32x128xf32, #tpu.memory_space<vmem>>, vector<32x128xf32>,
    return
  }
}

</mosaic_0001>

<bundles_post_ra>
// kernel: tpu_custom_call.1
= control target key start
LH: loop header
LB: loop body
LE: loop exit
PB: predicated region body
PF: predicated region fallthrough
CT: control target
= control target key end

     0   :  { %17 = vsyncpa [#allocation8], 0  ;;  %s1607_s0 = inlined_call_operand.hbm [shape: f32[32,64], index: 0, kind: input, shape index: {}]   ;;  %s1608_s1 = inlined_call_operand.hbm [shape: f32[192,128], index: 1, kind: input, shape index: {}]   ;;  %s1609_s2 = inlined_call_operand.vmem [shape: f32[1,128], index: 2, kind: input, shape index: {}]   ;;  %s1610_s3 = inlined_call_operand.hbm [shape: f32[384,128], index: 3, kind: input, shape index: {}]   ;;  %s1611_s4 = inlined_call_operand.vmem [shape: f32[1,128], index: 4, kind: input, shape index: {}]   ;;  %s1612_s5 = inlined_call_operand.vmem [shape: f32[1,128], index: 5, kind: input, shape index: {}]   ;;  %s1613_s6 = inlined_call_operand.vmem [shape: f32[1,128], index: 6, kind: input, shape index: {}]   ;;  %s1614_s7 = inlined_call_operand.hbm [shape: f32[128,128], index: 7, kind: input, shape index: {}]   ;;  %s1615_s8 = inlined_call_operand.<no memory space> [shape: f32[1], index: 8, kind: input, shape index: {}]   ;;  %s1616_s9 = inlined_call_operand.<no memory space> [shape: f32[1], index: 9, kind: input, shape index: {}]   ;;  %s1617_s10 = inlined_call_operand.hbm [shape: f32[32,128], index: 10, kind: output, shape index: {}]  }
   0x1   :  { %18 = vsyncpa [#allocation11], 0 }
   0x2   :  { %19 = vsyncpa [#allocation14], 0 }
   0x3   :  { %20 = vsyncpa [#allocation9], 0  ;;  %s1395_s13 = smov [#allocation10]   ;;  %s1396_s15 = smov [#allocation7]  }
   0x4   :  { %s38_s14 = sshll.u32 %s1395_s13, 4  ;;  %s26_s16 = sshll.u32 %s1396_s15, 4  ;;  %s39_s14 = int_to_ptr.vmem [resolvable:$true] %s38_s14  ;;  %s1460_s16 = int_to_ptr.vmem [resolvable:$true] %s26_s16 }
   0x5   :  { %s1277_s19 = scalar_lea.hbm %s1608_s1, 3072 }
   0x6   :  { %p1278_p0 = scmp.ne.s32.totalorder %s1608_s1, %s1277_s19  ;;  %p1281_p1 = scmp.lt.u32.totalorder %s1277_s19, %s1608_s1 }
   0x8   :  { %p1283_p2 = pnand %p1281_p1, %p1278_p0 }
   0xa   :  { %1286 = shalt.err (!%p1283_p2)
}
   0xb   :  { %s1287_s24 = scalar_lea.vmem %s39_s14, 3072  ;;  %p1292_p4 = scmp.lt.s32.totalorder %s39_s14, %s39_s14 }
   0xc   :  { %p1288_p3 = scmp.ne.s32.totalorder %s39_s14, %s1287_s24  ;;  %p1293_p5 = scmp.lt.s32.totalorder %s1287_s24, %s1287_s24 }
   0xe   :  { %p1294_p6 = por %p1293_p5, %p1292_p4 }
  0x10   :  { %p1295_p7 = pnand %p1294_p6, %p1288_p3 }
  0x12   :  { %1298 = shalt.err (!%p1295_p7)
}
  0x13   :  { %s1397_s25 = smov 128   ;;  %s1398_s26 = smov 8  }
  0x14   :  { %44 = dma.hbm_to_vmem [thread:$0]  %s1608_s1, 3072, %s39_s14, [#allocation11], %s1397_s25, %s1397_s25, %s1398_s26  }
  0x15   :  { %s1299_s11 = scalar_lea.hbm %s1607_s0, 512 }
  0x16   :  { %p1300_p8 = scmp.ne.s32.totalorder %s1607_s0, %s1299_s11  ;;  %p1303_p9 = scmp.lt.u32.totalorder %s1299_s11, %s1607_s0 }
  0x18   :  { %p1305_p10 = pnand %p1303_p9, %p1300_p8 }
  0x1a   :  { %1308 = shalt.err (!%p1305_p10)
}
  0x1b   :  { %s1309_s18 = scalar_lea.vmem %s1460_s16, 512  ;;  %p1314_p12 = scmp.lt.s32.totalorder %s1460_s16, %s1460_s16 }
  0x1c   :  { %p1310_p11 = scmp.ne.s32.totalorder %s1460_s16, %s1309_s18  ;;  %p1315_p13 = scmp.lt.s32.totalorder %s1309_s18, %s1309_s18 }
  0x1e   :  { %p1316_p0 = por %p1315_p13, %p1314_p12 }
  0x20   :  { %p1317_p1 = pnand %p1316_p0, %p1310_p11 }
  0x22   :  { %1320 = shalt.err (!%p1317_p1)
}
  0x23   :  { %32 = dma.hbm_to_vmem [thread:$0]  %s1607_s0, 512, %s1460_s16, [#allocation8], %s1397_s25, %s1397_s25, %s1398_s26  }
  0x24   :  { %s1399_s19 = smov [#allocation12]   ;;  %s1400_s21 = smov [#allocation13]  }
  0x25   :  { %s52_s20 = sshll.u32 %s1399_s19, 4  ;;  %s70_s22 = sshll.u32 %s1400_s21, 4  ;;  %s53_s20 = int_to_ptr.vmem [resolvable:$true] %s52_s20  ;;  %s1497_s22 = int_to_ptr.vmem [resolvable:$true] %s70_s22 }
  0x26   :  { %s1321_s27 = scalar_lea.hbm %s1610_s3, 6144 }
  0x27   :  { %p1322_p2 = scmp.ne.s32.totalorder %s1610_s3, %s1321_s27  ;;  %p1325_p3 = scmp.lt.u32.totalorder %s1321_s27, %s1610_s3 }
  0x29   :  { %p1327_p4 = pnand %p1325_p3, %p1322_p2 }
  0x2b   :  { %1330 = shalt.err (!%p1327_p4)
}
  0x2c   :  { %s1331_s0 = scalar_lea.vmem %s53_s20, 6144  ;;  %p1336_p6 = scmp.lt.s32.totalorder %s53_s20, %s53_s20 }
  0x2d   :  { %p1332_p5 = scmp.ne.s32.totalorder %s53_s20, %s1331_s0  ;;  %p1337_p7 = scmp.lt.s32.totalorder %s1331_s0, %s1331_s0 }
  0x2f   :  { %p1338_p8 = por %p1337_p7, %p1336_p6 }
  0x31   :  { %p1339_p9 = pnand %p1338_p8, %p1332_p5 }
  0x33   :  { %1342 = shalt.err (!%p1339_p9)
}
  0x34   :  { %58 = dma.hbm_to_vmem [thread:$0]  %s1610_s3, 6144, %s53_s20, [#allocation11], %s1397_s25, %s1397_s25, %s1398_s26  }
  0x35   :  { %s1343_s17 = scalar_lea.hbm %s1614_s7, 2048 }
  0x36   :  { %p1344_p10 = scmp.ne.s32.totalorder %s1614_s7, %s1343_s17  ;;  %p1347_p11 = scmp.lt.u32.totalorder %s1343_s17, %s1614_s7 }
  0x38   :  { %p1349_p12 = pnand %p1347_p11, %p1344_p10 }
  0x3a   :  { %1352 = shalt.err (!%p1349_p12)
}
  0x3b   :  { %s1353_s21 = scalar_lea.vmem %s1497_s22, 2048  ;;  %p1358_p0 = scmp.lt.s32.totalorder %s1497_s22, %s1497_s22 }
  0x3c   :  { %p1354_p13 = scmp.ne.s32.totalorder %s1497_s22, %s1353_s21  ;;  %p1359_p1 = scmp.lt.s32.totalorder %s1353_s21, %s1353_s21 }
  0x3e   :  { %p1360_p2 = por %p1359_p1, %p1358_p0 }
  0x40   :  { %p1361_p3 = pnand %p1360_p2, %p1354_p13 }
  0x42   :  { %1364 = shalt.err (!%p1361_p3)
}
  0x43   :  { %76 = dma.hbm_to_vmem [thread:$0]  %s1614_s7, 2048, %s1497_s22, [#allocation14], %s1397_s25, %s1397_s25, %s1398_s26  }
  0x44   :  { %1387 = dma.done.wait [#allocation8], 512  }
  0x45   :  { %1388 = vsyncadd [#allocation8], 4294966784 }
  0x46   :  { %1389 = dma.done.wait [#allocation11], 9216  }
  0x47   :  { %1390 = vsyncadd [#allocation11], 4294958080 }
  0x48   :  { %1391 = dma.done.wait [#allocation14], 2048  }
  0x49   :  { %1392 = vsyncadd [#allocation14], 4294965248  ;;  %v1401_v0 = vmov 0.0|0.0   ;;  %v1402_v1 = vmov 0.0   ;;  %vm94_vm0 = vcmask 523264   ;;  %v115_v2 = vld [vmem:[#allocation7] sm:$0xff] }
  0x4a   :  { %1101 = vmatprep.subr.bf16.mxu0 %v1401_v0  ;;  %93 = vst [vmem:[#allocation2] sm:$0xff] %v1402_v1  ;;  %96 = vst [vmem:[#allocation2 + $0x10] sm:$0xff] %v1402_v1  ;;  %v144_v3 = vld [vmem:[#allocation7 + $0x10] sm:$0xff]  ;;  %vm112_vm1 = vcmask 523265   ;;  %s1403_s7 = smov 64   ;;  %v116_v4 = vld [vmem:[#allocation7 + $0x8] sm:$0xff] }
  0x4b   :  { %98 = vst [vmem:[#allocation2 + $0x20] sm:$0xff] %v1402_v1  ;;  %100 = vst [vmem:[#allocation2 + $0x30] sm:$0xff] %v1402_v1  ;;  %119 = vrot.lane.b32.xlu0 %v115_v2, %s1403_s7  ;;  %148 = vrot.lane.b32.xlu1 %v144_v3, %s1403_s7  ;;  %v168_v5 = vld [vmem:[#allocation10] sm:$0xff]  ;;  %v169_v6 = vld [vmem:[#allocation10 + $0x8] sm:$0xff]  ;;  %v107_v7 = vrot.slane %v115_v2, 7  ;;  %v137_v8 = vrot.slane %v144_v3, 7 }
  0x4c   :  { %314 = vst [vmem:[#allocation4] sm:$0xff] %v1402_v1  ;;  %319 = vst [vmem:[#allocation4 + $0x28] sm:$0xff] %v1402_v1  ;;  %v145_v9 = vld [vmem:[#allocation7 + $0x18] sm:$0xff]  ;;  %v1102_v10 = vpack.c.bf16 %v169_v6, %v168_v5  ;;  %v170_v11 = vld [vmem:[#allocation10 + $0x10] sm:$0xff]  ;;  %vm106_vm2 = vcmask 1040384   ;;  %vm131_vm3 = vcmask 522240  }
  0x4d   :  { %320 = vst [vmem:[#allocation4 + $0x30] sm:$0xff] %v1402_v1  ;;  %325 = vst [vmem:[#allocation4 + $0x58] sm:$0xff] %v1402_v1  ;;  %v171_v12 = vld [vmem:[#allocation10 + $0x18] sm:$0xff]  ;;  %v172_v14 = vld [vmem:[#allocation10 + $0x20] sm:$0xff]  ;;  %vm125_vm4 = vcmask 1048064   ;;  %s1404_s0 = smov [#allocation15]  }
  0x4e   :  { %95 = vst.msk [vmem:[#allocation2 + $0x8] sm:$0xff] %vm94_vm0, %v1402_v1  ;;  %97 = vst.msk [vmem:[#allocation2 + $0x18] sm:$0xff] %vm94_vm0, %v1402_v1  ;;  %1103 = vmatpush1.bf16.msra.mxu0 %v1102_v10  ;;  %v1105_v13 = vpack.c.bf16 %v171_v12, %v170_v11  ;;  %v173_v15 = vld [vmem:[#allocation10 + $0x28] sm:$0xff]  ;;  %v174_v18 = vld [vmem:[#allocation10 + $0x30] sm:$0xff]  ;;  %s863_s16 = sshll.u32 %s1404_s0, 4  ;;  %s864_s16 = int_to_ptr.vmem [resolvable:$true] %s863_s16 }
  0x4f   :  { %99 = vst.msk [vmem:[#allocation2 + $0x28] sm:$0xff] %vm94_vm0, %v1402_v1  ;;  %101 = vst.msk [vmem:[#allocation2 + $0x38] sm:$0xff] %vm94_vm0, %v1402_v1  ;;  %121 = vrot.lane.b32.xlu0 %v116_v4, %s1403_s7  ;;  %150 = vrot.lane.b32.xlu1 %v145_v9, %s1403_s7  ;;  %v1108_v16 = vpack.c.bf16 %v173_v15, %v172_v14  ;;  %v103_v17 = vld [vmem:[#allocation7 + $0x8] sm:$0x7f]  ;;  %v175_v19 = vld [vmem:[#allocation10 + $0x38] sm:$0xff]  ;;  %p1370_p5 = scmp.lt.s32.totalorder %s864_s16, %s864_s16 }
  0x50   :  { %113 = vst.msk [vmem:[#allocation2] sm:$0xfe] %vm112_vm1, %v107_v7  ;;  %142 = vst.msk [vmem:[#allocation2 + $0x20] sm:$0xfe] %vm112_vm1, %v137_v8  ;;  %1104 = vmatprep.subr.bf16.mxu0 %v1401_v0  ;;  %v108_v20 = vrot.slane %v103_v17, 7  ;;  %v128_v21 = vld [vmem:[#allocation7 + $0x1] sm:$0xff]  ;;  %v1111_v32 = vpack.c.bf16 %v175_v19, %v174_v18 }
  0x51   :  { %130 = vst.msk [vmem:[#allocation2 + $0x8] sm:$0xff] %vm94_vm0, %v128_v21  ;;  %v134_v22 = vld [vmem:[#allocation7 + $0x18] sm:$0x7f]  ;;  %v129_v23 = vld [vmem:[#allocation7 + $0x9] sm:$0x7f]  ;;  %v176_v25 = vld [vmem:[#allocation10 + $0x40] sm:$0xff] }
  0x52   :  { %1106 = vmatpush1.bf16.msra.mxu0 %v1105_v13  ;;  %v156_v24 = vld [vmem:[#allocation7 + $0x11] sm:$0xff]  ;;  %v177_v26 = vld [vmem:[#allocation10 + $0x48] sm:$0xff]  ;;  %v109_v27 = vsel %vm106_vm2, %v107_v7, %v108_v20  ;;  %v138_v28 = vrot.slane %v134_v22, 7  ;;  %132 = vst.msk [vmem:[#allocation2 + $0x18] sm:$0x7f] %vm131_vm3, %v129_v23  ;;  %v392_v30 = vld [vmem:[#allocation12 + $0x80] sm:$0xff] }
  0x53   :  { %1107 = vmatprep.subr.bf16.mxu0 %v1401_v0  ;;  %158 = vst.msk [vmem:[#allocation2 + $0x28] sm:$0xff] %vm94_vm0, %v156_v24  ;;  %v157_v29 = vld [vmem:[#allocation7 + $0x19] sm:$0x7f]  ;;  %v393_v31 = vld [vmem:[#allocation12 + $0x88] sm:$0xff]  ;;  %114 = vst.msk [vmem:[#allocation2 + $0x10] sm:$0xff] %vm94_vm0, %v109_v27  ;;  %v1114_v46 = vpack.c.bf16 %v177_v26, %v176_v25 }
  0x54   :  { %159 = vst.msk [vmem:[#allocation2 + $0x38] sm:$0x7f] %vm131_vm3, %v157_v29  ;;  %v1137_v33 = vpack.c.bf16 %v393_v31, %v392_v30  ;;  %v376_v34 = vld [vmem:[#allocation12] sm:$0xff]  ;;  %v377_v35 = vld [vmem:[#allocation12 + $0x8] sm:$0xff]  ;;  %v394_v36 = vld [vmem:[#allocation12 + $0x90] sm:$0xff]  ;;  %v139_v37 = vsel %vm106_vm2, %v137_v8, %v138_v28 }
  0x55   :  { %v1139_v38 = vpack.c.bf16 %v377_v35, %v376_v34  ;;  %v395_v39 = vld [vmem:[#allocation12 + $0x98] sm:$0xff]  ;;  %v378_v40 = vld [vmem:[#allocation12 + $0x10] sm:$0xff]  ;;  %143 = vst.msk [vmem:[#allocation2 + $0x30] sm:$0xff] %vm94_vm0, %v139_v37  ;;  %v396_v43 = vld [vmem:[#allocation12 + $0xa0] sm:$0xff] }
  0x56   :  { %1109 = vmatpush1.bf16.msra.mxu0 %v1108_v16  ;;  %v379_v41 = vld [vmem:[#allocation12 + $0x18] sm:$0xff]  ;;  %1138 = vmatprep.subr.bf16.mxu1 %v1137_v33  ;;  %v1141_v42 = vpack.c.bf16 %v395_v39, %v394_v36  ;;  %v397_v44 = vld [vmem:[#allocation12 + $0xa8] sm:$0xff]  ;;  %v178_v48 = vld [vmem:[#allocation10 + $0x50] sm:$0xff] }
  0x57   :  { %1110 = vmatprep.subr.bf16.mxu0 %v1401_v0  ;;  %1140 = vmatpush3.bf16.msra.mxu1 %v1139_v38  ;;  %v1143_v45 = vpack.c.bf16 %v379_v41, %v378_v40  ;;  %v1145_v47 = vpack.c.bf16 %v397_v44, %v396_v43  ;;  %v179_v49 = vld [vmem:[#allocation10 + $0x58] sm:$0xff]  ;;  %v180_v52 = vld [vmem:[#allocation10 + $0x60] sm:$0xff]  ;;  %v181_v53 = vld [vmem:[#allocation10 + $0x68] sm:$0xff] }
  0x58   :  { %1142 = vmatprep.subr.bf16.mxu1 %v1141_v42  ;;  %v161_v50 = vld [vmem:[#allocation2 + $0x8] sm:$0xff]  ;;  %v1117_v51 = vpack.c.bf16 %v179_v49, %v178_v48  ;;  %v1120_v54 = vpack.c.bf16 %v181_v53, %v180_v52  ;;  %v182_v55 = vld [vmem:[#allocation10 + $0x70] sm:$0xff]  ;;  %v183_v56 = vld [vmem:[#allocation10 + $0x78] sm:$0xff] }
  0x59   :  { %878 = vmatprep.mubr.msk.f32.mxu0 %vm94_vm0, %v161_v50  ;;  %v1123_v57 = vpack.c.bf16 %v183_v56, %v182_v55  ;;  %v184_v58 = vld [vmem:[#allocation10 + $0x80] sm:$0xff]  ;;  %v185_v59 = vld [vmem:[#allocation10 + $0x88] sm:$0xff]  ;;  %v186_v61 = vld [vmem:[#allocation10 + $0x90] sm:$0xff]  ;;  %v301_v55 = vstv %s1615_s8 }
  0x5a   :  { %1112 = vmatpush1.bf16.msra.mxu0 %v1111_v32  ;;  %v1126_v60 = vpack.c.bf16 %v185_v59, %v184_v58  ;;  %v187_v62 = vld [vmem:[#allocation10 + $0x98] sm:$0xff]  ;;  %v188_v1 = vld [vmem:[#allocation10 + $0xa0] sm:$0xff]  ;;  %v189_v2 = vld [vmem:[#allocation10 + $0xa8] sm:$0xff] }
  0x5b   :  { %1113 = vmatprep.subr.bf16.mxu0 %v1401_v0  ;;  %1144 = vmatpush3.bf16.msra.mxu1 %v1143_v45  ;;  %v1129_v63 = vpack.c.bf16 %v187_v62, %v186_v61  ;;  %v1132_v3 = vpack.c.bf16 %v189_v2, %v188_v1  ;;  %v190_v4 = vld [vmem:[#allocation10 + $0xb0] sm:$0xff]  ;;  %v191_v5 = vld [vmem:[#allocation10 + $0xb8] sm:$0xff]  ;;  %v165_v13 = vld [vmem:[#allocation2 + $0x28] sm:$0xff] }
  0x5c   :  { %1146 = vmatprep.subr.bf16.mxu1 %v1145_v47  ;;  %v1135_v6 = vpack.c.bf16 %v191_v5, %v190_v4  ;;  %v163_v11 = vld [vmem:[#allocation2 + $0x18] sm:$0xff]  ;;  %v380_v17 = vld [vmem:[#allocation12 + $0x20] sm:$0xff]  ;;  %v381_v18 = vld [vmem:[#allocation12 + $0x28] sm:$0xff] }
  0x5d   :  { %v167_v15 = vld [vmem:[#allocation2 + $0x38] sm:$0xff]  ;;  %v1147_v19 = vpack.c.bf16 %v381_v18, %v380_v17  ;;  %v398_v20 = vld [vmem:[#allocation12 + $0xb0] sm:$0xff]  ;;  %v400_v26 = vld [vmem:[#allocation12 + $0xc0] sm:$0xff] }
  0x5e   :  { %1115 = vmatpush1.bf16.msra.mxu0 %v1114_v46  ;;  %v399_v21 = vld [vmem:[#allocation12 + $0xb8] sm:$0xff]  ;;  %v382_v23 = vld [vmem:[#allocation12 + $0x30] sm:$0xff]  ;;  %v401_v27 = vld [vmem:[#allocation12 + $0xc8] sm:$0xff] }
  0x5f   :  { %1116 = vmatprep.subr.bf16.mxu0 %v1401_v0  ;;  %1148 = vmatpush3.bf16.msra.mxu1 %v1147_v19  ;;  %v1149_v22 = vpack.c.bf16 %v399_v21, %v398_v20  ;;  %v383_v24 = vld [vmem:[#allocation12 + $0x38] sm:$0xff]  ;;  %v1153_v28 = vpack.c.bf16 %v401_v27, %v400_v26  ;;  %v384_v29 = vld [vmem:[#allocation12 + $0x40] sm:$0xff]  ;;  %v385_v30 = vld [vmem:[#allocation12 + $0x48] sm:$0xff] }
  0x60   :  { %v1151_v25 = vpack.c.bf16 %v383_v24, %v382_v23  ;;  %v1155_v31 = vpack.c.bf16 %v385_v30, %v384_v29  ;;  %v402_v32 = vld [vmem:[#allocation12 + $0xd0] sm:$0xff]  ;;  %v403_v33 = vld [vmem:[#allocation12 + $0xd8] sm:$0xff]  ;;  %v404_v38 = vld [vmem:[#allocation12 + $0xe0] sm:$0xff] }
  0x61   :  { %1150 = vmatprep.subr.bf16.mxu1 %v1149_v22  ;;  %v1157_v34 = vpack.c.bf16 %v403_v33, %v402_v32  ;;  %v386_v35 = vld [vmem:[#allocation12 + $0x50] sm:$0xff]  ;;  %v387_v36 = vld [vmem:[#allocation12 + $0x58] sm:$0xff]  ;;  %v405_v39 = vld [vmem:[#allocation12 + $0xe8] sm:$0xff] }
  0x62   :  { %1118 = vmatpush1.bf16.msra.mxu0 %v1117_v51  ;;  %v1159_v37 = vpack.c.bf16 %v387_v36, %v386_v35  ;;  %v1161_v40 = vpack.c.bf16 %v405_v39, %v404_v38  ;;  %v388_v41 = vld [vmem:[#allocation12 + $0x60] sm:$0xff]  ;;  %v389_v42 = vld [vmem:[#allocation12 + $0x68] sm:$0xff]  ;;  %v406_v44 = vld [vmem:[#allocation12 + $0xf0] sm:$0xff] }
  0x63   :  { %1119 = vmatprep.subr.bf16.mxu0 %v1401_v0  ;;  %1152 = vmatpush3.bf16.msra.mxu1 %v1151_v25  ;;  %v1163_v43 = vpack.c.bf16 %v389_v42, %v388_v41  ;;  %v407_v45 = vld [vmem:[#allocation12 + $0xf8] sm:$0xff]  ;;  %v390_v47 = vld [vmem:[#allocation12 + $0x70] sm:$0xff]  ;;  %v408_v50 = vld [vmem:[#allocation12 + $0x100] sm:$0xff] }
  0x64   :  { %1154 = vmatprep.subr.bf16.mxu1 %v1153_v28  ;;  %v1165_v46 = vpack.c.bf16 %v407_v45, %v406_v44  ;;  %v391_v48 = vld [vmem:[#allocation12 + $0x78] sm:$0xff]  ;;  %v409_v51 = vld [vmem:[#allocation12 + $0x108] sm:$0xff]  ;;  %v877_v53 = vld [vmem:[%s1609_s2] ss:$0 sm:$0xff] }
  0x65   :  { %v1167_v49 = vpack.c.bf16 %v391_v48, %v390_v47  ;;  %v1169_v52 = vpack.c.bf16 %v409_v51, %v408_v50  ;;  %v413_v17 = vld [vmem:[#allocation12 + $0x128] sm:$0xff]  ;;  %v414_v24 = vld [vmem:[#allocation12 + $0x130] sm:$0xff]  ;;  %v415_v25 = vld [vmem:[#allocation12 + $0x138] sm:$0xff] }
  0x66   :  { %1121 = vmatpush1.bf16.msra.mxu0 %v1120_v54  ;;  %v1181_v27 = vpack.c.bf16 %v415_v25, %v414_v24  ;;  %v416_v29 = vld [vmem:[#allocation12 + $0x140] sm:$0xff]  ;;  %v417_v30 = vld [vmem:[#allocation12 + $0x148] sm:$0xff]  ;;  %v418_v36 = vld [vmem:[#allocation12 + $0x150] sm:$0xff] }
  0x67   :  { %1122 = vmatprep.subr.bf16.mxu0 %v1401_v0  ;;  %1156 = vmatpush3.bf16.msra.mxu1 %v1155_v31  ;;  %v421_v41 = vld [vmem:[#allocation12 + $0x168] sm:$0xff]  ;;  %v423_v44 = vld [vmem:[#allocation12 + $0x178] sm:$0xff]  ;;  %v615_v48 = vld [vmem:[#allocation13] sm:$0xff] }
  0x68   :  { %1158 = vmatprep.subr.bf16.mxu1 %v1157_v34  ;;  %v1185_v34 = vpack.c.bf16 %v417_v30, %v416_v29  ;;  %v617_v51 = vld [vmem:[#allocation13 + $0x10] sm:$0xff] }
  0x6a   :  { %1124 = vmatpush1.bf16.msra.mxu0 %v1123_v57 }
  0x6b   :  { %1125 = vmatprep.subr.bf16.mxu0 %v1401_v0  ;;  %1160 = vmatpush3.bf16.msra.mxu1 %v1159_v37  ;;  %v419_v37 = vld [vmem:[#allocation12 + $0x158] sm:$0xff] }
  0x6c   :  { %1162 = vmatprep.subr.bf16.mxu1 %v1161_v40  ;;  %v1189_v39 = vpack.c.bf16 %v419_v37, %v418_v36  ;;  %v420_v40 = vld [vmem:[#allocation12 + $0x160] sm:$0xff] }
  0x6d   :  { %v1193_v42 = vpack.c.bf16 %v421_v41, %v420_v40 }
  0x6e   :  { %1127 = vmatpush1.bf16.msra.mxu0 %v1126_v60 }
  0x6f   :  { %1128 = vmatprep.subr.bf16.mxu0 %v1401_v0  ;;  %1164 = vmatpush3.bf16.msra.mxu1 %v1163_v43  ;;  %v422_v43 = vld [vmem:[#allocation12 + $0x170] sm:$0xff] }
  0x70   :  { %1166 = vmatprep.subr.bf16.mxu1 %v1165_v46  ;;  %v1197_v45 = vpack.c.bf16 %v423_v44, %v422_v43 }
  0x72   :  { %1130 = vmatpush1.bf16.msra.mxu0 %v1129_v63 }
  0x73   :  { %1131 = vmatprep.subr.bf16.mxu0 %v1401_v0  ;;  %1168 = vmatpush3.bf16.msra.mxu1 %v1167_v49  ;;  %v616_v49 = vld [vmem:[#allocation13 + $0x8] sm:$0xff] }
  0x74   :  { %1170 = vmatprep.subr.bf16.mxu1 %v1169_v52  ;;  %v1201_v50 = vpack.c.bf16 %v616_v49, %v615_v48 }
  0x76   :  { %1133 = vmatpush1.bf16.msra.mxu0 %v1132_v3 }
  0x77   :  { %1134 = vmatprep.subr.bf16.mxu0 %v1401_v0 }
  0x7a   :  { %1136 = vmatpush1.bf16.msra.mxu0 %v1135_v6 }
  0x7b   :  { %1202 = vmatprep.subr.bf16.mxu0 %v1201_v50 }
  0xbd   :  { %v120_v7 = vpop.permute.xlu0 %119  ;;  %v149_v8 = vpop.permute.xlu1 %148 }
  0xbe   :  { %126 = vst.msk [vmem:[#allocation2] sm:$0xff] %vm125_vm4, %v120_v7  ;;  %154 = vst.msk [vmem:[#allocation2 + $0x20] sm:$0xff] %vm125_vm4, %v149_v8  ;;  %v410_v7 = vld [vmem:[#allocation12 + $0x110] sm:$0xff]  ;;  %v411_v8 = vld [vmem:[#allocation12 + $0x118] sm:$0xff] }
  0xc1   :  { %v122_v9 = vpop.permute.xlu0 %121  ;;  %v151_v10 = vpop.permute.xlu1 %150 }
  0xc2   :  { %127 = vst.msk [vmem:[#allocation2 + $0x10] sm:$0xff] %vm125_vm4, %v122_v9  ;;  %155 = vst.msk [vmem:[#allocation2 + $0x30] sm:$0xff] %vm125_vm4, %v151_v10 }
  0xc5   :  { %v160_v12 = vld [vmem:[#allocation2] sm:$0xff] }
  0xc6   :  { %276 = vmatmul.mubr.f32.vlgmr.msra.gmra.mrb[0].mxu0 %v160_v12  ;;  %v164_v0 = vld [vmem:[#allocation2 + $0x20] sm:$0xff] }
  0xc7   :  { %879 = vmatprep.mubr.msk.f32.mxu0 %vm94_vm0, %v163_v11  ;;  %1204 = vmatpush3.bf16.msra.mxu0 %v1201_v50 }
  0xc9   :  { %v162_v14 = vld [vmem:[#allocation2 + $0x10] sm:$0xff] }
  0xca   :  { %281 = vmatmul.mubr.f32.gmra.mrb[2].mxu0 %v162_v14  ;;  %v166_v16 = vld [vmem:[#allocation2 + $0x30] sm:$0xff] }
  0xcb   :  { %880 = vmatprep.mubr.msk.f32.mxu0 %vm94_vm0, %v165_v13  ;;  %v1173_v13 = vpack.c.bf16 %v411_v8, %v410_v7  ;;  %v630_v7 = vld [vmem:[#allocation13 + $0x78] sm:$0xff] }
  0xce   :  { %286 = vmatmul.mubr.f32.gmra.mrb[4].mxu0 %v164_v0 }
  0xcf   :  { %881 = vmatprep.mubr.msk.f32.mxu0 %vm94_vm0, %v167_v15 }
  0xd2   :  { %291 = vmatmul.mubr.f32.gmra.mrb[6].mxu0 %v166_v16  ;;  %v412_v16 = vld [vmem:[#allocation12 + $0x120] sm:$0xff] }
  0xd3   :  { %v1177_v23 = vpack.c.bf16 %v413_v17, %v412_v16 }
 0x199   :  { %v277_v54 = vpop.f32.mrb[0].mxu0 }
 0x19a   :  { %v278_v56 = vadd.f32 %v877_v53, %v277_v54  ;;  %v279_v57 = vpop.f32.mrb[1].mxu0 }
 0x19b   :  { %v621_v57 = vld [vmem:[#allocation13 + $0x30] sm:$0xff] }
 0x19c   :  { %vm296_vm5 = vcmp.ge.f32.partialorder %v278_v56, 0.0  ;;  %v302_v58 = vmul.f32 %v301_v55, %v278_v56 }
 0x19d   :  { %v282_v59 = vpop.f32.mrb[2].mxu0 }
 0x19e   :  { %v306_v60 = vsel %vm296_vm5, %v278_v56, %v302_v58  ;;  %v283_v61 = vadd.f32 %v877_v53, %v282_v59  ;;  %v284_v62 = vpop.f32.mrb[3].mxu0  ;;  %v622_v58 = vld [vmem:[#allocation13 + $0x38] sm:$0xff] }
 0x19f   :  { %310 = vst [vmem:[#allocation3] sm:$0xff] %v306_v60  ;;  %495 = vmatprep.mubr.f32.mxu1 %v306_v60  ;;  %v330_v63 = vrot.slane %v306_v60, 7  ;;  %v1213_v59 = vpack.c.bf16 %v622_v58, %v621_v57  ;;  %v623_v60 = vld [vmem:[#allocation13 + $0x40] sm:$0xff] }
 0x1a0   :  { %vm297_vm6 = vcmp.ge.f32.partialorder %v283_v61, 0.0  ;;  %v303_v1 = vmul.f32 %v301_v55, %v283_v61 }
 0x1a1   :  { %v287_v2 = vpop.f32.mrb[4].mxu0  ;;  %335 = vst [vmem:[#allocation4] sm:$0xfe] %v330_v63 }
 0x1a2   :  { %v307_v3 = vsel %vm297_vm6, %v283_v61, %v303_v1  ;;  %v288_v4 = vadd.f32 %v877_v53, %v287_v2  ;;  %v289_v5 = vpop.f32.mrb[5].mxu0  ;;  %v624_v61 = vld [vmem:[#allocation13 + $0x48] sm:$0xff]  ;;  %v626_v1 = vld [vmem:[#allocation13 + $0x58] sm:$0xff] }
 0x1a3   :  { %311 = vst [vmem:[#allocation3 + $0x8] sm:$0xff] %v307_v3  ;;  %v1217_v62 = vpack.c.bf16 %v624_v61, %v623_v60 }
 0x1a4   :  { %vm298_vm7 = vcmp.ge.f32.partialorder %v288_v4, 0.0  ;;  %v304_v6 = vmul.f32 %v301_v55, %v288_v4 }
 0x1a5   :  { %v292_v9 = vpop.f32.mrb[6].mxu0 }
 0x1a6   :  { %v308_v10 = vsel %vm298_vm7, %v288_v4, %v304_v6  ;;  %v293_v11 = vadd.f32 %v877_v53, %v292_v9  ;;  %v294_v12 = vpop.f32.mrb[7].mxu0  ;;  %v619_v53 = vld [vmem:[#allocation13 + $0x20] sm:$0xff]  ;;  %v628_v4 = vld [vmem:[#allocation13 + $0x68] sm:$0xff]  ;;  %v629_v6 = vld [vmem:[#allocation13 + $0x70] sm:$0xff] }
 0x1a7   :  { %312 = vst [vmem:[#allocation3 + $0x10] sm:$0xff] %v308_v10  ;;  %v349_v14 = vrot.slane %v308_v10, 7  ;;  %v1229_v8 = vpack.c.bf16 %v630_v7, %v629_v6 }
 0x1a8   :  { %vm299_vm8 = vcmp.ge.f32.partialorder %v293_v11, 0.0  ;;  %v305_v0 = vmul.f32 %v301_v55, %v293_v11  ;;  %v364_v15 = vld [vmem:[#allocation4] sm:$0xff]  ;;  %v620_v55 = vld [vmem:[#allocation13 + $0x28] sm:$0xff] }
 0x1a9   :  { %496 = vmatmul.mubr.f32.vlgmr.msra.gmra.mrb[0].mxu1 %v364_v15  ;;  %354 = vst [vmem:[#allocation4 + $0x30] sm:$0xfe] %v349_v14  ;;  %v1209_v56 = vpack.c.bf16 %v620_v55, %v619_v53 }
 0x1aa   :  { %v327_v18 = vld [vmem:[#allocation3 + $0x8] sm:$0x7f]  ;;  %v309_v20 = vsel %vm299_vm8, %v293_v11, %v305_v0  ;;  %1172 = vmatpush3.bf16.msra.mxu1 %v1169_v52  ;;  %500 = vmatprep.mubr.f32.mxu1 %v307_v3  ;;  %v618_v52 = vld [vmem:[#allocation13 + $0x18] sm:$0xff]  ;;  %v627_v3 = vld [vmem:[#allocation13 + $0x60] sm:$0xff] }
 0x1ab   :  { %v342_v19 = vld [vmem:[#allocation3 + $0x9] sm:$0x7f]  ;;  %v341_v21 = vld [vmem:[#allocation3 + $0x1] sm:$0xff]  ;;  %v331_v22 = vrot.slane %v327_v18, 7  ;;  %313 = vst [vmem:[#allocation3 + $0x18] sm:$0xff] %v309_v20  ;;  %1174 = vmatprep.subr.bf16.mxu1 %v1173_v13  ;;  %v1205_v54 = vpack.c.bf16 %v618_v52, %v617_v51  ;;  %v1225_v5 = vpack.c.bf16 %v628_v4, %v627_v3 }
 0x1ac   :  { %344 = vst [vmem:[#allocation4 + $0x28] sm:$0x7f] %v342_v19 }
 0x1ad   :  { %v332_v26 = vsel %vm106_vm2, %v330_v63, %v331_v22  ;;  %1206 = vmatprep.subr.bf16.mxu0 %v1205_v54  ;;  %v625_v63 = vld [vmem:[#allocation13 + $0x50] sm:$0xff] }
 0x1ae   :  { %1176 = vmatpush3.bf16.msra.mxu1 %v1173_v13  ;;  %1208 = vmatpush3.bf16.msra.mxu0 %v1205_v54  ;;  %v1221_v2 = vpack.c.bf16 %v626_v1, %v625_v63 }
 0x1af   :  { %501 = vmatmul.mubr.f32.gmra.mrb[2].mxu1 %v332_v26  ;;  %1178 = vmatprep.subr.bf16.mxu1 %v1177_v23 }
 0x1b0   :  { %505 = vmatprep.mubr.f32.mxu1 %v308_v10  ;;  %v370_v28 = vld [vmem:[#allocation4 + $0x30] sm:$0xff]  ;;  %1210 = vmatprep.subr.bf16.mxu0 %v1209_v56 }
 0x1b2   :  { %v346_v31 = vld [vmem:[#allocation3 + $0x18] sm:$0x7f]  ;;  %1180 = vmatpush3.bf16.msra.mxu1 %v1177_v23  ;;  %1212 = vmatpush3.bf16.msra.mxu0 %v1209_v56  ;;  %v606_v23 = vstv %s1616_s9 }
 0x1b3   :  { %v360_v32 = vld [vmem:[#allocation3 + $0x11] sm:$0xff]  ;;  %v350_v33 = vrot.slane %v346_v31, 7  ;;  %506 = vmatmul.mubr.f32.gmra.mrb[4].mxu1 %v370_v28  ;;  %1182 = vmatprep.subr.bf16.mxu1 %v1181_v27  ;;  %v361_v35 = vld [vmem:[#allocation3 + $0x19] sm:$0x7f]  ;;  %v369_v46 = vld [vmem:[#allocation4 + $0x28] sm:$0xff] }
 0x1b4   :  { %510 = vmatprep.mubr.f32.mxu1 %v309_v20  ;;  %363 = vst [vmem:[#allocation4 + $0x58] sm:$0x7f] %v361_v35  ;;  %1214 = vmatprep.subr.bf16.mxu0 %v1213_v59  ;;  %v882_v20 = vld [vmem:[%s1611_s4] ss:$0 sm:$0xff] }
 0x1b5   :  { %v351_v38 = vsel %vm106_vm2, %v349_v14, %v350_v33 }
 0x1b6   :  { %1184 = vmatpush3.bf16.msra.mxu1 %v1181_v27  ;;  %1216 = vmatpush3.bf16.msra.mxu0 %v1213_v59 }
 0x1b7   :  { %511 = vmatmul.mubr.f32.gmra.mrb[6].mxu1 %v351_v38  ;;  %1186 = vmatprep.subr.bf16.mxu1 %v1185_v34 }
 0x1b8   :  { %1019 = vmatprep.mubr.f32.mxu1 %v341_v21  ;;  %1218 = vmatprep.subr.bf16.mxu0 %v1217_v62 }
 0x1ba   :  { %1188 = vmatpush3.bf16.msra.mxu1 %v1185_v34  ;;  %1220 = vmatpush3.bf16.msra.mxu0 %v1217_v62 }
 0x1bb   :  { %1190 = vmatprep.subr.bf16.mxu1 %v1189_v39  ;;  %v375_v47 = vld [vmem:[#allocation4 + $0x58] sm:$0xff]  ;;  %1222 = vmatprep.subr.bf16.mxu0 %v1221_v2 }
 0x1be   :  { %1192 = vmatpush3.bf16.msra.mxu1 %v1189_v39  ;;  %1224 = vmatpush3.bf16.msra.mxu0 %v1221_v2 }
 0x1bf   :  { %1194 = vmatprep.subr.bf16.mxu1 %v1193_v42  ;;  %1226 = vmatprep.subr.bf16.mxu0 %v1225_v5 }
 0x1c2   :  { %1196 = vmatpush3.bf16.msra.mxu1 %v1193_v42  ;;  %1228 = vmatpush3.bf16.msra.mxu0 %v1225_v5 }
 0x1c3   :  { %1198 = vmatprep.subr.bf16.mxu1 %v1197_v45  ;;  %1230 = vmatprep.subr.bf16.mxu0 %v1229_v8 }
 0x1c6   :  { %1200 = vmatpush3.bf16.msra.mxu1 %v1197_v45  ;;  %1232 = vmatpush3.bf16.msra.mxu0 %v1229_v8 }
 0x1c7   :  { %1234 = vmatprep.subr.bf16.mxu1 %v1201_v50 }
 0x1c9   :  { %1020 = vmatmul.mubr.f32.vlgmr.msra.gmra.mrb[8].mxu1 %v369_v46 }
 0x1ca   :  { %1022 = vmatprep.mubr.f32.mxu1 %v360_v32  ;;  %1236 = vmatpush3.bf16.msra.mxu1 %v1201_v50 }
 0x1cb   :  { %1238 = vmatprep.subr.bf16.mxu1 %v1205_v54 }
 0x1cd   :  { %1023 = vmatmul.mubr.f32.gmra.mrb[10].mxu1 %v375_v47 }
 0x1ce   :  { %1240 = vmatpush3.bf16.msra.mxu1 %v1205_v54 }
 0x1cf   :  { %1242 = vmatprep.subr.bf16.mxu1 %v1209_v56 }
 0x1d2   :  { %1244 = vmatpush3.bf16.msra.mxu1 %v1209_v56 }
 0x1d3   :  { %1246 = vmatprep.subr.bf16.mxu1 %v1213_v59 }
 0x1d6   :  { %1248 = vmatpush3.bf16.msra.mxu1 %v1213_v59 }
 0x1d7   :  { %1250 = vmatprep.subr.bf16.mxu1 %v1217_v62 }
 0x1da   :  { %1252 = vmatpush3.bf16.msra.mxu1 %v1217_v62 }
 0x1db   :  { %1254 = vmatprep.subr.bf16.mxu1 %v1221_v2 }
 0x1de   :  { %1256 = vmatpush3.bf16.msra.mxu1 %v1221_v2 }
 0x1df   :  { %1258 = vmatprep.subr.bf16.mxu1 %v1225_v5 }
 0x1e2   :  { %1260 = vmatpush3.bf16.msra.mxu1 %v1225_v5 }
 0x1e3   :  { %1262 = vmatprep.subr.bf16.mxu1 %v1229_v8 }
 0x1e6   :  { %1264 = vmatpush3.bf16.msra.mxu1 %v1229_v8 }
 0x27c   :  { %v915_v9 = vpop.f32.mrb[0].mxu1 }
 0x27d   :  { %v916_v10 = vpop.f32.mrb[1].mxu1 }
 0x27e   :  { %v917_v11 = vadd.f32 %v916_v10, %v915_v9 }
 0x280   :  { %v498_v24 = vadd.f32 %v917_v11, %v882_v20 }
 0x282   :  { %v918_v12 = vpop.f32.mrb[2].mxu1 }
 0x283   :  { %v919_v13 = vpop.f32.mrb[3].mxu1 }
 0x284   :  { %v920_v14 = vadd.f32 %v919_v13, %v918_v12 }
 0x286   :  { %v921_v0 = vpop.f32.mrb[4].mxu1  ;;  %v503_v21 = vadd.f32 %v920_v14, %v882_v20 }
 0x287   :  { %v922_v15 = vpop.f32.mrb[5].mxu1 }
 0x288   :  { %v923_v16 = vadd.f32 %v922_v15, %v921_v0  ;;  %v836_v15 = vlaneseq }
 0x28a   :  { %v924_v17 = vpop.f32.mrb[6].mxu1  ;;  %v508_v32 = vadd.f32 %v923_v16, %v882_v20  ;;  %v837_v16 = vshrl.u32 %v836_v15, 7 }
 0x28b   :  { %v925_v18 = vpop.f32.mrb[7].mxu1 }
 0x28c   :  { %v926_v19 = vadd.f32 %v925_v18, %v924_v17  ;;  %v831_v17 = vld [vmem:[%s1612_s5] sm:$0x1]  ;;  %v838_v18 = vsub.s32 0, %v837_v16  ;;  %s1365_s5 = scalar_lea.vmem %s864_s16, 512 }
 0x28d   :  { %p1366_p4 = scmp.ne.s32.totalorder %s864_s16, %s1365_s5  ;;  %p1371_p6 = scmp.lt.s32.totalorder %s1365_s5, %s1365_s5 }
 0x28e   :  { %v513_v29 = vadd.f32 %v926_v19, %v882_v20 }
 0x28f   :  { %p1372_p7 = por %p1371_p6, %p1370_p5 }
 0x291   :  { %p1373_p8 = pnand %p1372_p7, %p1366_p4 }
 0x29c   :  { %v1021_v22 = vpop.f32.mrb[8].mxu1 }
 0x29d   :  { %v588_v25 = vadd.f32 %v1021_v22, %v503_v21  ;;  %v582_v26 = vpop.f32.mrb[9].mxu1  ;;  %v833_v21 = vld [vmem:[%s1613_s6] sm:$0x1] }
 0x29e   :  { %v583_v27 = vadd.f32 %v582_v26, %v498_v24 }
 0x29f   :  { %v608_v28 = vmul.f32 %v606_v23, %v588_v25  ;;  %vm602_vm9 = vcmp.ge.f32.partialorder %v588_v25, 0.0 }
 0x2a0   :  { %v607_v30 = vmul.f32 %v606_v23, %v583_v27  ;;  %v1024_v31 = vpop.f32.mrb[10].mxu1  ;;  %vm601_vm10 = vcmp.ge.f32.partialorder %v583_v27, 0.0 }
 0x2a1   :  { %v598_v33 = vadd.f32 %v1024_v31, %v513_v29  ;;  %v592_v34 = vpop.f32.mrb[11].mxu1  ;;  %v1578_v37 = vsel %vm602_vm9, %v588_v25, %v608_v28 }
 0x2a2   :  { %v593_v35 = vadd.f32 %v592_v34, %v508_v32  ;;  %v1576_v36 = vsel %vm601_vm10, %v583_v27, %v607_v30 }
 0x2a3   :  { %v610_v38 = vmul.f32 %v606_v23, %v598_v33  ;;  %1057 = vmatprep.mubr.f32.mxu0 %v1576_v36  ;;  %vm604_vm12 = vcmp.ge.f32.partialorder %v598_v33, 0.0 }
 0x2a4   :  { %v609_v39 = vmul.f32 %v606_v23, %v593_v35  ;;  %1058 = vmatmul.mubr.f32.vlgmr.msra.gmra.mrb[8].mxu0 %v1578_v37  ;;  %vm603_vm11 = vcmp.ge.f32.partialorder %v593_v35, 0.0 }
 0x2a5   :  { %v614_v41 = vsel %vm604_vm12, %v598_v33, %v610_v38 }
 0x2a6   :  { %v613_v40 = vsel %vm603_vm11, %v593_v35, %v609_v39 }
 0x2a7   :  { %1060 = vmatprep.mubr.f32.mxu0 %v613_v40 }
 0x2a8   :  { %1061 = vmatmul.mubr.f32.gmra.mrb[10].mxu0 %v614_v41 }
 0x377   :  { %v1059_v42 = vpop.f32.mrb[8].mxu0 }
 0x378   :  { %v697_v43 = vpop.f32.mrb[9].mxu0 }
 0x379   :  { %v716_v44 = vadd.f32 %v1059_v42, %v697_v43 }
 0x37b   :  { %v1062_v45 = vpop.f32.mrb[10].mxu0 }
 0x37c   :  { %v707_v46 = vpop.f32.mrb[11].mxu0 }
 0x37d   :  { %v717_v47 = vadd.f32 %v716_v44, %v707_v46 }
 0x37f   :  { %v718_v48 = vadd.f32 %v1062_v45, %v717_v47 }
 0x381   :  { %v719_v49 = vrot.slane %v718_v48, 4 }
 0x383   :  { %v720_v50 = vadd.f32 %v719_v49, %v718_v48 }
 0x385   :  { %v721_v51 = vrot.slane %v720_v50, 2 }
 0x387   :  { %v722_v52 = vadd.f32 %v721_v51, %v720_v50 }
 0x389   :  { %v723_v53 = vrot.slane %v722_v52, 1 }
 0x38b   :  { %v724_v54 = vadd.f32 %v723_v53, %v722_v52 }
 0x38d   :  { %v725_v55 = vmul.f32 0.001953125, %v724_v54 }
 0x38f   :  { %v726_v56 = vsub.f32 %v1576_v36, %v725_v55  ;;  %v727_v57 = vsub.f32 %v1578_v37, %v725_v55  ;;  %v728_v58 = vsub.f32 %v613_v40, %v725_v55  ;;  %v729_v61 = vsub.f32 %v614_v41, %v725_v55 }
 0x391   :  { %v730_v59 = vmul.f32 %v726_v56, %v726_v56  ;;  %v731_v60 = vmul.f32 %v727_v57, %v727_v57  ;;  %v732_v62 = vmul.f32 %v728_v58, %v728_v58  ;;  %v733_v63 = vmul.f32 %v729_v61, %v729_v61 }
 0x393   :  { %1095 = vmatprep.mubr.f32.mxu1 %v730_v59 }
 0x394   :  { %1096 = vmatmul.mubr.f32.vlgmr.msra.gmra.mrb[12].mxu1 %v731_v60 }
 0x395   :  { %1098 = vmatprep.mubr.f32.mxu1 %v732_v62 }
 0x398   :  { %1099 = vmatmul.mubr.f32.gmra.mrb[14].mxu1 %v733_v63 }
 0x467   :  { %v1097_v1 = vpop.f32.mrb[12].mxu1 }
 0x468   :  { %v800_v2 = vpop.f32.mrb[13].mxu1 }
 0x469   :  { %v819_v3 = vadd.f32 %v1097_v1, %v800_v2 }
 0x46b   :  { %v1100_v4 = vpop.f32.mrb[14].mxu1 }
 0x46c   :  { %v810_v5 = vpop.f32.mrb[15].mxu1 }
 0x46d   :  { %v820_v6 = vadd.f32 %v819_v3, %v810_v5 }
 0x46f   :  { %v821_v7 = vadd.f32 %v1100_v4, %v820_v6 }
 0x471   :  { %v822_v8 = vrot.slane %v821_v7, 4 }
 0x473   :  { %v823_v9 = vadd.f32 %v822_v8, %v821_v7 }
 0x475   :  { %v824_v10 = vrot.slane %v823_v9, 2 }
 0x477   :  { %v825_v11 = vadd.f32 %v824_v10, %v823_v9 }
 0x479   :  { %v826_v12 = vrot.slane %v825_v11, 1 }
 0x47b   :  { %v827_v13 = vadd.f32 %v826_v12, %v825_v11 }
 0x47d   :  { %v828_v14 = vmul.f32 0.001953125, %v827_v13 }
 0x47f   :  { %v829_v0 = vadd.f32 1e-05, %v828_v14 }
 0x481   :  { %1275 = vrsqrt.f32 %v829_v0 }
 0x48b   :  { %v1276_v19 = vpop.eup %1275 }
 0x48c   :  { %v832_v20 = vmul.f32 %v1276_v19, %v831_v17 }
 0x48e   :  { %v834_v22 = vmul.f32 %v832_v20, %v725_v55  ;;  %v839_v23 = vrot.slane %v832_v20, %v838_v18 }
 0x490   :  { %v835_v24 = vsub.f32 %v833_v21, %v834_v22  ;;  %v840_v25 = vmul.f32 %v839_v23, %v1576_v36  ;;  %v841_v26 = vmul.f32 %v839_v23, %v1578_v37  ;;  %v842_v27 = vmul.f32 %v839_v23, %v613_v40 }
 0x491   :  { %v843_v28 = vmul.f32 %v839_v23, %v614_v41 }
 0x492   :  { %v848_v29 = vrot.slane %v835_v24, %v838_v18 }
 0x494   :  { %v850_v30 = vadd.f32 %v848_v29, %v840_v25  ;;  %v851_v31 = vadd.f32 %v848_v29, %v841_v26  ;;  %v852_v32 = vadd.f32 %v848_v29, %v842_v27  ;;  %v853_v33 = vadd.f32 %v848_v29, %v843_v28 }
 0x496   :  { %854 = vst [vmem:[#allocation15] sm:$0xff] %v850_v30  ;;  %855 = vst [vmem:[#allocation15 + $0x8] sm:$0xff] %v851_v31 }
 0x497   :  { %856 = vst [vmem:[#allocation15 + $0x10] sm:$0xff] %v852_v32  ;;  %857 = vst [vmem:[#allocation15 + $0x18] sm:$0xff] %v853_v33 }
 0x498   :  { %1376 = shalt.err (!%p1373_p8)
}
 0x499   :  { %s1377_s13 = scalar_lea.hbm %s1617_s10, 512 }
 0x49a   :  { %p1378_p9 = scmp.ne.s32.totalorder %s1617_s10, %s1377_s13  ;;  %p1381_p10 = scmp.lt.u32.totalorder %s1377_s13, %s1617_s10 }
 0x49c   :  { %p1383_p11 = pnand %p1381_p10, %p1378_p9 }
 0x49e   :  { %1386 = shalt.err (!%p1383_p11)
}
 0x49f   :  { %869 = dma.vmem_to_hbm [thread:$0]  %s864_s16, 512, %s1617_s10, [#allocation9], %s1397_s25, %s1397_s25, %s1398_s26  }
 0x4a0   :  { %1393 = dma.done.wait [#allocation9], 512  }
 0x4a1   :  { %1394 = vsyncadd [#allocation9], 4294966784 }
 0x4a2   :  { %873 = vsyncpa [#allocation8], 1 }
 0x4a3   :  { %874 = vsyncpa [#allocation11], 1 }
 0x4a4   :  { %875 = vsyncpa [#allocation14], 1 }
 0x4a5   :  { %876 = vsyncpa [#allocation9], 1 }

</bundles_post_ra>
